<compile_context>
chip_gen: v7x
topology: tpu7x:2x2x1
jax: 0.10.0
libtpu: 0.0.40
codegen_flags: <defaults>
</compile_context>

<pallas_src>
import functools
import math

import jax
import jax.numpy as jnp
from jax.experimental import pallas as pl
from jax.experimental.pallas import tpu as pltpu

DIM_EMBED = 32
NUM_HEADS = 2
DIM_HEAD = DIM_EMBED // NUM_HEADS      # 16
SEQ_LEN = 12
DIM_HEAD_PAD = 128                     # lane-dense output width (multiple of 128)
NEG_INF = -1e30                        # finite "masked" value


def head_kernel(x_ref, start_ref, wq_ref, bq_ref, wk_ref, bk_ref, wv_ref, bv_ref,
                o_ref):
    x = x_ref[...]                                            # (rows, 32), rows = BB*SEQ_LEN
    rows = x.shape[0]
    scale = jnp.float32(1.0 / math.sqrt(DIM_HEAD))

    # q/k/v projections as single wide matmuls over all rows of this batch block.
    q = (jnp.dot(x, wq_ref[...], preferred_element_type=jnp.float32)
         + bq_ref[...]) * scale                               # (rows, 16), scale folded into q
    k = jnp.dot(x, wk_ref[...], preferred_element_type=jnp.float32) + bk_ref[...]
    v = jnp.dot(x, wv_ref[...], preferred_element_type=jnp.float32) + bv_ref[...]  # (rows, 128)

    # Scores: contract the last dims directly -> no explicit (rows, 16) transpose of k.
    s = jax.lax.dot_general(q, k, (((1,), (1,)), ((), ())),
                            preferred_element_type=jnp.float32)  # (rows, rows)

    # Block-diagonal causal mask built in-kernel (VPU iota + compares, no HBM mask):
    # global row i may attend to global column j iff start(i) <= j <= i, where
    # start(i) is the first row index of i's batch element within this block.
    gi = jax.lax.broadcasted_iota(jnp.int32, (rows, rows), 0)
    gj = jax.lax.broadcasted_iota(jnp.int32, (rows, rows), 1)
    ok = (gj >= start_ref[...]) & (gj <= gi)                  # (rows,1) lane-broadcast
    s = jnp.where(ok, s, NEG_INF)

    # Row-wise softmax (stable; masked entries underflow to exactly 0).
    m = jnp.max(s, axis=-1, keepdims=True)
    p = jnp.exp(s - m)
    denom = jnp.sum(p, axis=-1, keepdims=True)
    p = p * pl.reciprocal(denom, approx=True)

    o_ref[...] = jnp.dot(p, v, preferred_element_type=jnp.float32)   # (rows, 128)


def _full_spec(shape):
    nd = len(shape)
    return pl.BlockSpec(shape, lambda i, _nd=nd: (0,) * _nd)


@functools.partial(jax.jit, static_argnames=("batch_block",))
def head_forward(x, params, *, batch_block=8):
    """x: (B, SEQ_LEN, DIM_EMBED) f32 -> (B, SEQ_LEN, DIM_HEAD) f32."""
    B, S, D = x.shape
    assert S == SEQ_LEN and D == DIM_EMBED

    # BB batch elements per grid step; BB kept even so rows = BB*SEQ_LEN is a
    # multiple of 8 sublanes.
    bb = min(batch_block, B)
    if bb % 2:
        bb += 1
    b_pad = pl.cdiv(B, bb) * bb
    if b_pad != B:
        x = jnp.pad(x, ((0, b_pad - B), (0, 0), (0, 0)))
    rows = bb * SEQ_LEN
    x2 = x.reshape(b_pad * SEQ_LEN, DIM_EMBED)

    # Tiny per-row "start of my batch element" index vector (constant-folded by XLA).
    r = jnp.arange(rows, dtype=jnp.int32)
    row_start = ((r // SEQ_LEN) * SEQ_LEN).reshape(rows, 1)

    wq, bq = params["wq"], params["bq"].reshape(1, DIM_HEAD)
    wk, bk = params["wk"], params["bk"].reshape(1, DIM_HEAD)
    # Pad the value projection to 128 output lanes -> unmasked (lane-dense) stores.
    wv = jnp.pad(params["wv"], ((0, 0), (0, DIM_HEAD_PAD - DIM_HEAD)))
    bv = jnp.pad(params["bv"].reshape(1, DIM_HEAD),
                 ((0, 0), (0, DIM_HEAD_PAD - DIM_HEAD)))

    out = pl.pallas_call(
        head_kernel,
        out_shape=jax.ShapeDtypeStruct((b_pad * SEQ_LEN, DIM_HEAD_PAD), jnp.float32),
        grid_spec=pltpu.PrefetchScalarGridSpec(
            num_scalar_prefetch=0,
            grid=(b_pad // bb,),
            in_specs=[
                pl.BlockSpec((rows, DIM_EMBED), lambda i: (i, 0)),
                _full_spec(row_start.shape),
                _full_spec(wq.shape), _full_spec(bq.shape),
                _full_spec(wk.shape), _full_spec(bk.shape),
                _full_spec(wv.shape), _full_spec(bv.shape),
            ],
            out_specs=pl.BlockSpec((rows, DIM_HEAD_PAD), lambda i: (i, 0)),
        ),
        compiler_params=pltpu.CompilerParams(dimension_semantics=("parallel",)),
    )(x2, row_start, wq, bq, wk, bk, wv, bv)

    return out[:B * SEQ_LEN, :DIM_HEAD].reshape(B, SEQ_LEN, DIM_HEAD)


def init_params(key):
    """Mirrors nn.Linear(DIM_EMBED, DIM_HEAD) default init: U(-1/sqrt(in), 1/sqrt(in))."""
    ks = jax.random.split(key, 6)
    bound = 1.0 / math.sqrt(DIM_EMBED)

    def u(k, shape):
        return jax.random.uniform(k, shape, jnp.float32, -bound, bound)

    return {
        "wq": u(ks[0], (DIM_EMBED, DIM_HEAD)), "bq": u(ks[1], (DIM_HEAD,)),
        "wk": u(ks[2], (DIM_EMBED, DIM_HEAD)), "bk": u(ks[3], (DIM_HEAD,)),
        "wv": u(ks[4], (DIM_EMBED, DIM_HEAD)), "bv": u(ks[5], (DIM_HEAD,)),
    }


def reference_forward(x, params):
    """Pure-JAX mirror of the PyTorch Head.forward."""
    q = x @ params["wq"] + params["bq"]
    k = x @ params["wk"] + params["bk"]
    v = x @ params["wv"] + params["bv"]
    s = jnp.einsum("bqd,bkd->bqk", q, k) / math.sqrt(DIM_HEAD)
    mask = jnp.triu(jnp.ones((SEQ_LEN, SEQ_LEN), dtype=bool), k=1)
    s = jnp.where(mask, -jnp.inf, s)
    w = jax.nn.softmax(s, axis=-1)
    return jnp.einsum("bqk,bkd->bqd", w, v)


if __name__ == "__main__":
    key = jax.random.PRNGKey(0)
    pkey, xkey = jax.random.split(key)
    params = init_params(pkey)

    B = 2
    x = jax.random.normal(xkey, (B, SEQ_LEN, DIM_EMBED), dtype=jnp.float32)

    out = jax.block_until_ready(head_forward(x, params))
    ref = reference_forward(x, params)

    assert out.shape == (B, SEQ_LEN, DIM_HEAD), out.shape
    max_err = float(jnp.max(jnp.abs(out - ref)))
    # pl.reciprocal(approx=True) -> slightly looser tolerance than exact f32.
    assert jnp.allclose(out, ref, rtol=1e-2, atol=1e-3), max_err
    print("KERNEL_OK")
</pallas_src>

<mosaic_0001>
module attributes {stable_mosaic.version = 11 : i64} {
  func.func @head_kernel(%arg0: i32, %arg1: memref<24x32xf32, #tpu.memory_space<vmem>>, %arg2: memref<24x1xi32, #tpu.memory_space<vmem>>, %arg3: memref<32x16xf32, #tpu.memory_space<vmem>>, %arg4: memref<1x16xf32, #tpu.memory_space<vmem>>, %arg5: memref<32x16xf32, #tpu.memory_space<vmem>>, %arg6: memref<1x16xf32, #tpu.memory_space<vmem>>, %arg7: memref<32x128xf32, #tpu.memory_space<vmem>>, %arg8: memref<1x128xf32, #tpu.memory_space<vmem>>, %arg9: memref<24x128xf32, #tpu.memory_space<vmem>>) attributes {dimension_semantics = [#tpu.dimension_semantics<parallel>], iteration_bounds = array<i64: 1>, scalar_prefetch = 0 : i64, scratch_operands = 0 : i64, tpu.core_type = #tpu.core_type<tc>, window_params = [{transform_indices = @transform_0, window_bounds = array<i64: 24, 32>}, {pipeline_mode = #tpu.pipeline_mode<synchronous>, transform_indices = @transform_1, window_bounds = array<i64: 24, 1>}, {pipeline_mode = #tpu.pipeline_mode<synchronous>, transform_indices = @transform_2, window_bounds = array<i64: 32, 16>}, {pipeline_mode = #tpu.pipeline_mode<synchronous>, transform_indices = @transform_3, window_bounds = array<i64: 1, 16>}, {pipeline_mode = #tpu.pipeline_mode<synchronous>, transform_indices = @transform_4, window_bounds = array<i64: 32, 16>}, {pipeline_mode = #tpu.pipeline_mode<synchronous>, transform_indices = @transform_5, window_bounds = array<i64: 1, 16>}, {pipeline_mode = #tpu.pipeline_mode<synchronous>, transform_indices = @transform_6, window_bounds = array<i64: 32, 128>}, {pipeline_mode = #tpu.pipeline_mode<synchronous>, transform_indices = @transform_7, window_bounds = array<i64: 1, 128>}, {transform_indices = @transform_8, window_bounds = array<i64: 24, 128>}]} {
    %c0 = arith.constant 0 : index
    %c0_0 = arith.constant 0 : index
    %0 = vector.load %arg1[%c0, %c0_0] : memref<24x32xf32, #tpu.memory_space<vmem>>, vector<24x32xf32>
    %c0_1 = arith.constant 0 : index
    %c0_2 = arith.constant 0 : index
    %1 = vector.load %arg3[%c0_1, %c0_2] : memref<32x16xf32, #tpu.memory_space<vmem>>, vector<32x16xf32>
    %cst = arith.constant dense<0.000000e+00> : vector<24x16xf32>
    %2 = tpu.matmul %0, %1, %cst {dimension_numbers = #tpu.dot_dimension_numbers<[1], [0], [0], [1], [0, 0, 1, 1], [], []>} : vector<24x32xf32>, vector<32x16xf32>, vector<24x16xf32> -> vector<24x16xf32>
    %c0_3 = arith.constant 0 : index
    %c0_4 = arith.constant 0 : index
    %3 = vector.load %arg4[%c0_3, %c0_4] : memref<1x16xf32, #tpu.memory_space<vmem>>, vector<1x16xf32>
    %4 = vector.broadcast %3 : vector<1x16xf32> to vector<24x16xf32>
    %5 = arith.addf %2, %4 : vector<24x16xf32>
    %cst_5 = arith.constant 2.500000e-01 : f32
    %6 = vector.broadcast %cst_5 : f32 to vector<24x16xf32>
    %7 = arith.mulf %5, %6 : vector<24x16xf32>
    %c0_6 = arith.constant 0 : index
    %c0_7 = arith.constant 0 : index
    %8 = vector.load %arg5[%c0_6, %c0_7] : memref<32x16xf32, #tpu.memory_space<vmem>>, vector<32x16xf32>
    %cst_8 = arith.constant dense<0.000000e+00> : vector<24x16xf32>
    %9 = tpu.matmul %0, %8, %cst_8 {dimension_numbers = #tpu.dot_dimension_numbers<[1], [0], [0], [1], [0, 0, 1, 1], [], []>} : vector<24x32xf32>, vector<32x16xf32>, vector<24x16xf32> -> vector<24x16xf32>
    %c0_9 = arith.constant 0 : index
    %c0_10 = arith.constant 0 : index
    %10 = vector.load %arg6[%c0_9, %c0_10] : memref<1x16xf32, #tpu.memory_space<vmem>>, vector<1x16xf32>
    %11 = vector.broadcast %10 : vector<1x16xf32> to vector<24x16xf32>
    %12 = arith.addf %9, %11 : vector<24x16xf32>
    %c0_11 = arith.constant 0 : index
    %c0_12 = arith.constant 0 : index
    %13 = vector.load %arg7[%c0_11, %c0_12] : memref<32x128xf32, #tpu.memory_space<vmem>>, vector<32x128xf32>
    %cst_13 = arith.constant dense<0.000000e+00> : vector<24x128xf32>
    %14 = tpu.matmul %0, %13, %cst_13 {dimension_numbers = #tpu.dot_dimension_numbers<[1], [0], [0], [1], [0, 0, 1, 1], [], []>} : vector<24x32xf32>, vector<32x128xf32>, vector<24x128xf32> -> vector<24x128xf32>
    %c0_14 = arith.constant 0 : index
    %c0_15 = arith.constant 0 : index
    %15 = vector.load %arg8[%c0_14, %c0_15] : memref<1x128xf32, #tpu.memory_space<vmem>>, vector<1x128xf32>
    %16 = vector.broadcast %15 : vector<1x128xf32> to vector<24x128xf32>
    %17 = arith.addf %14, %16 : vector<24x128xf32>
    %cst_16 = arith.constant dense<0.000000e+00> : vector<24x24xf32>
    %18 = tpu.matmul %7, %12, %cst_16 {dimension_numbers = #tpu.dot_dimension_numbers<[1], [1], [0], [0], [0, 0, 1, 0], [], []>} : vector<24x16xf32>, vector<24x16xf32>, vector<24x24xf32> -> vector<24x24xf32>
    %19 = tpu.iota {dimensions = array<i32: 0>} : vector<24x24xi32>
    %20 = tpu.iota {dimensions = array<i32: 1>} : vector<24x24xi32>
    %c0_17 = arith.constant 0 : index
    %c0_18 = arith.constant 0 : index
    %21 = vector.load %arg2[%c0_17, %c0_18] : memref<24x1xi32, #tpu.memory_space<vmem>>, vector<24x1xi32>
    %22 = vector.broadcast %21 : vector<24x1xi32> to vector<24x24xi32>
    %23 = arith.cmpi sge, %20, %22 : vector<24x24xi32>
    %24 = arith.cmpi sle, %20, %19 : vector<24x24xi32>
    %25 = arith.andi %23, %24 : vector<24x24xi1>
    %cst_19 = arith.constant -1.000000e+30 : f32
    %26 = vector.broadcast %cst_19 : f32 to vector<24x24xf32>
    %27 = arith.select %25, %18, %26 : vector<24x24xi1>, vector<24x24xf32>
    %cst_20 = arith.constant dense<0xFF800000> : vector<24xf32>
    %28 = vector.multi_reduction <maximumf>, %27, %cst_20 [1] : vector<24x24xf32> to vector<24xf32>
    %29 = vector.shape_cast %28 : vector<24xf32> to vector<24x1xf32>
    %30 = vector.broadcast %29 : vector<24x1xf32> to vector<24x24xf32>
    %31 = arith.subf %27, %30 : vector<24x24xf32>
    %32 = math.exp %31 : vector<24x24xf32>
    %cst_21 = arith.constant dense<0.000000e+00> : vector<24xf32>
    %33 = vector.multi_reduction <add>, %32, %cst_21 [1] : vector<24x24xf32> to vector<24xf32>
    %34 = vector.shape_cast %33 : vector<24xf32> to vector<24x1xf32>
    %35 = tpu.reciprocal %34 {approx = true} : vector<24x1xf32> -> vector<24x1xf32>
    %36 = vector.broadcast %35 : vector<24x1xf32> to vector<24x24xf32>
    %37 = arith.mulf %32, %36 : vector<24x24xf32>
    %cst_22 = arith.constant dense<0.000000e+00> : vector<24x128xf32>
    %38 = tpu.matmul %37, %17, %cst_22 {dimension_numbers = #tpu.dot_dimension_numbers<[1], [0], [0], [1], [0, 0, 1, 1], [], []>} : vector<24x24xf32>, vector<24x128xf32>, vector<24x128xf32> -> vector<24x128xf32>
    %c0_23 = arith.constant 0 : index
    %c0_24 = arith.constant 0 : index
    %39 = vector.load %arg9[%c0_23, %c0_24] : memref<24x128xf32, #tpu.memory_space<vmem>>, vector<24x128xf32>
    tpu.vector_store %arg9[%c0_23, %c0_24], %38 {strides = array<i32>} : memref<24x128xf32, #tpu.memory_space<vmem>>, vector<24x128xf32>,
    return
  }
  func.func @transform_0(%arg0: i32) -> (i32, i32) {
    %c0_i32 = arith.constant 0 : i32
    %c0_i32_0 = arith.constant 0 : i32
    return %arg0, %c0_i32 : i32, i32
  }
  func.func @transform_1(%arg0: i32) -> (i32, i32) {
    %c0_i32 = arith.constant 0 : i32
    %c0_i32_0 = arith.constant 0 : i32
    %c0_i32_1 = arith.constant 0 : i32
    return %c0_i32, %c0_i32_0 : i32, i32
  }
  func.func @transform_2(%arg0: i32) -> (i32, i32) {
    %c0_i32 = arith.constant 0 : i32
    %c0_i32_0 = arith.constant 0 : i32
    %c0_i32_1 = arith.constant 0 : i32
    return %c0_i32, %c0_i32_0 : i32, i32
  }
  func.func @transform_3(%arg0: i32) -> (i32, i32) {
    %c0_i32 = arith.constant 0 : i32
    %c0_i32_0 = arith.constant 0 : i32
    %c0_i32_1 = arith.constant 0 : i32
    return %c0_i32, %c0_i32_0 : i32, i32
  }
  func.func @transform_4(%arg0: i32) -> (i32, i32) {
    %c0_i32 = arith.constant 0 : i32
    %c0_i32_0 = arith.constant 0 : i32
    %c0_i32_1 = arith.constant 0 : i32
    return %c0_i32, %c0_i32_0 : i32, i32
  }
  func.func @transform_5(%arg0: i32) -> (i32, i32) {
    %c0_i32 = arith.constant 0 : i32
    %c0_i32_0 = arith.constant 0 : i32
    %c0_i32_1 = arith.constant 0 : i32
    return %c0_i32, %c0_i32_0 : i32, i32
  }
  func.func @transform_6(%arg0: i32) -> (i32, i32) {
    %c0_i32 = arith.constant 0 : i32
    %c0_i32_0 = arith.constant 0 : i32
    %c0_i32_1 = arith.constant 0 : i32
    return %c0_i32, %c0_i32_0 : i32, i32
  }
  func.func @transform_7(%arg0: i32) -> (i32, i32) {
    %c0_i32 = arith.constant 0 : i32
    %c0_i32_0 = arith.constant 0 : i32
    %c0_i32_1 = arith.constant 0 : i32
    return %c0_i32, %c0_i32_0 : i32, i32
  }
  func.func @transform_8(%arg0: i32) -> (i32, i32) {
    %c0_i32 = arith.constant 0 : i32
    %c0_i32_0 = arith.constant 0 : i32
    return %arg0, %c0_i32 : i32, i32
  }
}

</mosaic_0001>

<bundles_post_ra>
// kernel: head_forward.1
= control target key start
LH: loop header
LB: loop body
LE: loop exit
PB: predicated region body
PF: predicated region fallthrough
CT: control target
= control target key end

     0   :  { %v759_v0 = vmov 0.0|0.0   ;;  %vm760_vm0 = vmmov 0   ;;  %v761_v4 = vmov 0.0   ;;  %vm43_vm1 = vcmask 261120   ;;  %s961_s2 = inlined_call_operand.vmem [shape: f32[32,16], index: 2, kind: input, shape index: {}]   ;;  %s962_s4 = inlined_call_operand.vmem [shape: f32[32,16], index: 4, kind: input, shape index: {}]   ;;  %s963_s0 = inlined_call_operand.vmem [shape: f32[24,32], index: 0, kind: input, shape index: {}]   ;;  %s964_s1 = inlined_call_operand.vmem [shape: s32[24,1], index: 1, kind: input, shape index: {}]   ;;  %s965_s5 = inlined_call_operand.vmem [shape: f32[1,16], index: 5, kind: input, shape index: {}]   ;;  %s966_s3 = inlined_call_operand.vmem [shape: f32[1,16], index: 3, kind: input, shape index: {}]   ;;  %s967_s6 = inlined_call_operand.vmem [shape: f32[32,128], index: 6, kind: input, shape index: {}]   ;;  %s968_s7 = inlined_call_operand.vmem [shape: f32[1,128], index: 7, kind: input, shape index: {}]   ;;  %s969_s8 = inlined_call_operand.vmem [shape: f32[24,128], index: 8, kind: output, shape index: {}]  }
   0x1   :  { %737 = vmatprep.subr.bf16.mxu1 %v759_v0  ;;  %v32_v1 = vld [vmem:[%s961_s2] sm:$0xff]  ;;  %v33_v2 = vld [vmem:[%s961_s2 + $0x8] sm:$0xff]  ;;  %v34_v3 = vld [vmem:[%s961_s2 + $0x10] sm:$0xff]  ;;  %645 = vmatprep.mubr.msk.f32.mxu1 %vm760_vm0, %v761_v4  ;;  %v762_v17 = vmov 0   ;;  %vm318_vm2 = vcmask 130048   ;;  %v417_v51 = vlaneseq  ;;  %vm447_vm7 = vcmask 195584  }
   0x2   :  { %v713_v5 = vpack.c.bf16 %v33_v2, %v32_v1  ;;  %v35_v6 = vld [vmem:[%s961_s2 + $0x18] sm:$0xff]  ;;  %712 = vmatprep.subr.bf16.mxu0 %v759_v0  ;;  %639 = vmatprep.mubr.msk.f32.mxu0 %vm760_vm0, %v761_v4  ;;  %v136_v8 = vld [vmem:[%s962_s4] sm:$0xff]  ;;  %v137_v9 = vld [vmem:[%s962_s4 + $0x8] sm:$0xff] }
   0x3   :  { %v716_v7 = vpack.c.bf16 %v35_v6, %v34_v3  ;;  %v837_v10 = vld [vmem:[%s963_s0 + $0x10] sm:$0xff]  ;;  %v719_v11 = vpack.c.bf16 %v137_v9, %v136_v8  ;;  %v139_v13 = vld [vmem:[%s962_s4 + $0x18] sm:$0xff]  ;;  %v850_v14 = vld [vmem:[%s963_s0] sm:$0xff]  ;;  %745 = vset.pattern.permute.xlu0 %v762_v17  ;;  %746 = vset.pattern.permute.xlu1 %v762_v17  ;;  %v422_v52 = vand.u32 127, %v417_v51  ;;  %v418_v54 = vshrl.u32 %v417_v51, 7 }
   0x4   :  { %739 = vmatpush3.bf16.msra.mxu1 %v713_v5  ;;  %714 = vmatpush3.bf16.msra.mxu0 %v713_v5  ;;  %v138_v12 = vld [vmem:[%s962_s4 + $0x10] sm:$0xff]  ;;  %v864_v16 = vld [vmem:[%s963_s0 + $0x8] sm:$0xff]  ;;  %v423_v18 = vld [vmem:[%s964_s1] sm:$0xff] }
   0x5   :  { %738 = vmatprep.subr.bf16.mxu1 %v759_v0  ;;  %715 = vmatprep.subr.bf16.mxu0 %v759_v0  ;;  %v722_v15 = vpack.c.bf16 %v139_v13, %v138_v12  ;;  %v425_v19 = vld [vmem:[%s964_s1 + $0x10] sm:$0xff]  ;;  %v424_v20 = vld [vmem:[%s964_s1 + $0x8] sm:$0xff]  ;;  %v581_v29 = vld [vmem:[%s965_s5] ss:$0 sm:$0xff]  ;;  %vm438_vm5 = vcmp.le.s32.totalorder %v422_v52, %v418_v54  ;;  %v419_v55 = vadd.s32 8, %v418_v54  ;;  %v420_v57 = vadd.s32 16, %v418_v54 }
   0x6   :  { %427 = vperm.xlu0 %745, %v423_v18   ;;  %433 = vperm.xlu1 %746, %v425_v19   ;;  %vm732_vm3 = vmpackc.low %vm318_vm2, %vm318_vm2  ;;  %v577_v37 = vld [vmem:[%s966_s3] ss:$0 sm:$0xff]  ;;  %v228_v46 = vld [vmem:[%s967_s6 + $0x8] sm:$0xff] }
   0x7   :  { %v227_v45 = vld [vmem:[%s967_s6] sm:$0xff]  ;;  %v229_v47 = vld [vmem:[%s967_s6 + $0x10] sm:$0xff]  ;;  %v230_v49 = vld [vmem:[%s967_s6 + $0x18] sm:$0xff]  ;;  %vm439_vm9 = vcmp.le.s32.totalorder %v422_v52, %v419_v55  ;;  %vm440_vm11 = vcmp.le.s32.totalorder %v422_v52, %v420_v57 }
   0x8   :  { %740 = vmatpush3.bf16.msra.mxu1 %v716_v7  ;;  %717 = vmatpush3.bf16.msra.mxu0 %v716_v7  ;;  %v725_v48 = vpack.c.bf16 %v228_v46, %v227_v45  ;;  %v728_v50 = vpack.c.bf16 %v230_v49, %v229_v47  ;;  %v585_v8 = vld [vmem:[%s968_s7] ss:$0 sm:$0xff] }
   0x9   :  { %718 = vmatprep.subr.bf16.mxu1 %v759_v0  ;;  %724 = vmatprep.subr.bf16.mxu0 %v759_v0 }
   0xa   :  { %430 = vperm.xlu0 %745, %v424_v20  }
   0xb   :  { %646 = vmatmul.mubr.msk.f32.vlgmr.msra.gmra.mrb[0].mxu1 %vm43_vm1, %v837_v10  ;;  %640 = vmatmul.mubr.msk.f32.vlgmr.msra.gmra.mrb[0].mxu0 %vm43_vm1, %v850_v14 }
   0xc   :  { %720 = vmatpush3.bf16.msra.mxu1 %v719_v11  ;;  %656 = vmatprep.mubr.msk.f32.mxu1 %vm760_vm0, %v761_v4 }
   0xd   :  { %721 = vmatprep.subr.bf16.mxu1 %v759_v0  ;;  %642 = vmatprep.mubr.msk.f32.mxu0 %vm760_vm0, %v761_v4 }
   0xe   :  { %726 = vmatpush3.bf16.msra.mxu0 %v725_v48 }
   0xf   :  { %643 = vmatmul.mubr.msk.f32.gmra.mrb[2].mxu0 %vm43_vm1, %v864_v16  ;;  %727 = vmatprep.subr.bf16.mxu0 %v759_v0 }
  0x10   :  { %723 = vmatpush3.bf16.msra.mxu1 %v722_v15  ;;  %673 = vmatprep.mubr.msk.f32.mxu0 %vm760_vm0, %v761_v4 }
  0x11   :  { %730 = vmatprep.subr.bf16.mxu1 %v759_v0 }
  0x12   :  { %729 = vmatpush3.bf16.msra.mxu0 %v728_v50 }
  0x13   :  { %657 = vmatmul.mubr.msk.f32.vlgmr.msra.gmra.mrb[2].mxu1 %vm43_vm1, %v850_v14  ;;  %734 = vmatprep.subr.bf16.mxu0 %v759_v0 }
  0x14   :  { %659 = vmatprep.mubr.msk.f32.mxu1 %vm760_vm0, %v761_v4 }
  0x15   :  { %674 = vmatmul.mubr.msk.f32.vlgmr.msra.gmra.mrb[4].mxu0 %vm43_vm1, %v850_v14 }
  0x16   :  { %676 = vmatprep.mubr.msk.f32.mxu0 %vm760_vm0, %v761_v4 }
  0x17   :  { %660 = vmatmul.mubr.msk.f32.gmra.mrb[4].mxu1 %vm43_vm1, %v864_v16 }
  0x18   :  { %662 = vmatprep.mubr.msk.f32.mxu1 %vm760_vm0, %v761_v4 }
  0x19   :  { %677 = vmatmul.mubr.msk.f32.gmra.mrb[6].mxu0 %vm43_vm1, %v864_v16 }
  0x1a   :  { %679 = vmatprep.mubr.msk.f32.mxu0 %vm760_vm0, %v761_v4 }
  0x1b   :  { %663 = vmatmul.mubr.msk.f32.gmra.mrb[6].mxu1 %vm43_vm1, %v837_v10 }
  0x1c   :  { %688 = vmatprep.mubr.msk.f32.mxu1 %vm760_vm0, %v761_v4 }
  0x1d   :  { %680 = vmatmul.mubr.msk.f32.gmra.mrb[8].mxu0 %vm43_vm1, %v837_v10 }
  0x1e   :  { %703 = vmatprep.mubr.msk.f32.mxu0 %vm760_vm0, %v761_v4 }
  0x85   :  { %v428_v53 = vpop.permute.xlu0 %427  ;;  %v434_v59 = vpop.permute.xlu1 %433 }
  0x86   :  { %vm435_vm4 = vcmp.ge.s32.totalorder %v422_v52, %v428_v53  ;;  %vm437_vm10 = vcmp.ge.s32.totalorder %v422_v52, %v434_v59 }
  0x87   :  { %vm441_vm6 = vmand %vm435_vm4, %vm438_vm5 }
  0x88   :  { %vm443_vm13 = vmand %vm437_vm10, %vm440_vm11 }
  0x89   :  { %v431_v56 = vpop.permute.xlu0 %430 }
  0x8a   :  { %vm436_vm8 = vcmp.ge.s32.totalorder %v422_v52, %v431_v56 }
  0x8b   :  { %vm442_vm12 = vmand %vm436_vm8, %vm439_vm9 }
  0xde   :  { %v129_v21 = vpop.f32.mrb[0].mxu1  ;;  %v119_v22 = vpop.f32.mrb[0].mxu0 }
  0xdf   :  { %v647_v23 = vpop.f32.mrb[1].mxu1  ;;  %v641_v24 = vpop.f32.mrb[1].mxu0  ;;  %v120_v38 = vadd.f32 %v577_v37, %v119_v22  ;;  %v130_v43 = vadd.f32 %v577_v37, %v129_v21 }
  0xe1   :  { %v133_v40 = vmul.f32 0.25, %v120_v38  ;;  %v135_v44 = vmul.f32 0.25, %v130_v43 }
  0xe2   :  { %v124_v25 = vpop.f32.mrb[2].mxu0 }
  0xe3   :  { %v644_v26 = vpop.f32.mrb[3].mxu0  ;;  %v125_v41 = vadd.f32 %v577_v37, %v124_v25 }
  0xe5   :  { %v134_v42 = vmul.f32 0.25, %v125_v41 }
  0xe6   :  { %v213_v27 = vpop.f32.mrb[2].mxu1 }
  0xe7   :  { %v658_v28 = vpop.f32.mrb[3].mxu1  ;;  %v214_v31 = vadd.f32 %v581_v29, %v213_v27 }
  0xe8   :  { %v304_v9 = vpop.f32.mrb[4].mxu0 }
  0xe9   :  { %v675_v10 = vpop.f32.mrb[5].mxu0  ;;  %v305_v11 = vadd.f32 %v585_v8, %v304_v9 }
  0xea   :  { %v218_v30 = vpop.f32.mrb[4].mxu1 }
  0xeb   :  { %v219_v32 = vadd.f32 %v581_v29, %v218_v30  ;;  %v661_v33 = vpop.f32.mrb[5].mxu1 }
  0xec   :  { %v309_v12 = vpop.f32.mrb[6].mxu0 }
  0xed   :  { %v731_v34 = vpack.c.bf16 %v219_v32, %v214_v31  ;;  %v310_v13 = vadd.f32 %v585_v8, %v309_v12  ;;  %v678_v14 = vpop.f32.mrb[7].mxu0 }
  0xee   :  { %v223_v35 = vpop.f32.mrb[6].mxu1 }
  0xef   :  { %733 = vmatpush3.bf16.xpose.msk.msra.mxu1 %vm732_vm3, %v731_v34  ;;  %v664_v36 = vpop.f32.mrb[7].mxu1  ;;  %v224_v39 = vadd.f32 %v581_v29, %v223_v35  ;;  %v735_v15 = vpack.c.bf16 %v310_v13, %v305_v11 }
  0xf0   :  { %686 = vmatprep.subr.mxu1 %v761_v4  ;;  %v314_v31 = vpop.f32.mrb[8].mxu0 }
  0xf1   :  { %736 = vmatpush3.bf16.msra.mxu0 %v735_v15  ;;  %v681_v32 = vpop.f32.mrb[9].mxu0  ;;  %v315_v33 = vadd.f32 %v585_v8, %v314_v31 }
  0xf2   :  { %701 = vmatprep.subr.mxu0 %v761_v4 }
  0xf5   :  { %702 = vmatpush3.msra.mxu0 %v315_v33 }
  0xf7   :  { %687 = vmatpush3.xpose.msk.msra.mxu1 %vm318_vm2, %v224_v39 }
  0xfa   :  { %689 = vmatmul.mubr.msk.f32.vlgmr.msra.gmra.mrb[8].mxu1 %vm318_vm2, %v133_v40 }
  0xfb   :  { %691 = vmatprep.mubr.msk.f32.mxu1 %vm760_vm0, %v761_v4 }
  0xfe   :  { %692 = vmatmul.mubr.msk.f32.gmra.mrb[10].mxu1 %vm318_vm2, %v134_v42 }
  0xff   :  { %694 = vmatprep.mubr.msk.f32.mxu1 %vm760_vm0, %v761_v4 }
 0x102   :  { %695 = vmatmul.mubr.msk.f32.gmra.mrb[12].mxu1 %vm318_vm2, %v135_v44 }
 0x1cd   :  { %v403_v58 = vpop.f32.mrb[8].mxu1 }
 0x1ce   :  { %v444_v60 = vsel %vm441_vm6, %v403_v58, -1e+30  ;;  %v690_v61 = vpop.f32.mrb[9].mxu1 }
 0x1cf   :  { %v448_v62 = vsel %vm447_vm7, %v444_v60, -inf }
 0x1d0   :  { %449 = vmax.xlane.f32.xlu1 %v448_v62 }
 0x1d1   :  { %v408_v63 = vpop.f32.mrb[10].mxu1 }
 0x1d2   :  { %v445_v0 = vsel %vm442_vm12, %v408_v63, -1e+30  ;;  %v693_v1 = vpop.f32.mrb[11].mxu1 }
 0x1d3   :  { %v451_v2 = vsel %vm447_vm7, %v445_v0, -inf }
 0x1d4   :  { %452 = vmax.xlane.f32.xlu0 %v451_v2 }
 0x1d5   :  { %v413_v3 = vpop.f32.mrb[12].mxu1 }
 0x1d6   :  { %v446_v5 = vsel %vm443_vm13, %v413_v3, -1e+30  ;;  %v696_v6 = vpop.f32.mrb[13].mxu1 }
 0x1d7   :  { %v454_v7 = vsel %vm447_vm7, %v446_v5, -inf }
 0x1d8   :  { %455 = vmax.xlane.f32.xlu0 %v454_v7 }
 0x25d   :  { %v450_v16 = vpop.xlane.xlu1 %449 }
 0x25e   :  { %v457_v17 = vsub.f32 %v444_v60, %v450_v16 }
 0x260   :  { %v460_v18 = vmul.f32 1.442695, %v457_v17 }
 0x261   :  { %v453_v19 = vpop.xlane.xlu0 %452 }
 0x262   :  { %747 = vpow2.f32 %v460_v18  ;;  %v458_v20 = vsub.f32 %v445_v0, %v453_v19 }
 0x264   :  { %v462_v21 = vmul.f32 1.442695, %v458_v20 }
 0x265   :  { %v456_v22 = vpop.xlane.xlu0 %455 }
 0x266   :  { %749 = vpow2.f32 %v462_v21  ;;  %v459_v23 = vsub.f32 %v446_v5, %v456_v22 }
 0x268   :  { %v464_v24 = vmul.f32 1.442695, %v459_v23 }
 0x26a   :  { %751 = vpow2.f32 %v464_v24 }
 0x26c   :  { %v748_v25 = vpop.eup %747 }
 0x26d   :  { %v466_v26 = vsel %vm447_vm7, %v748_v25, 0.0 }
 0x26e   :  { %467 = vadd.xlane.f32.xlu1 %v466_v26 }
 0x270   :  { %v750_v27 = vpop.eup %749 }
 0x271   :  { %v469_v28 = vsel %vm447_vm7, %v750_v27, 0.0 }
 0x272   :  { %470 = vadd.xlane.f32.xlu0 %v469_v28 }
 0x274   :  { %v752_v29 = vpop.eup %751 }
 0x275   :  { %v472_v30 = vsel %vm447_vm7, %v752_v29, 0.0 }
 0x276   :  { %473 = vadd.xlane.f32.xlu1 %v472_v30 }
 0x2fb   :  { %v468_v34 = vpop.xlane.xlu1 %467 }
 0x2fc   :  { %753 = vrcp.f32 %v468_v34 }
 0x2ff   :  { %v471_v35 = vpop.xlane.xlu0 %470 }
 0x300   :  { %755 = vrcp.f32 %v471_v35 }
 0x303   :  { %v474_v36 = vpop.xlane.xlu1 %473 }
 0x304   :  { %757 = vrcp.f32 %v474_v36 }
 0x306   :  { %v754_v37 = vpop.eup %753 }
 0x307   :  { %v478_v38 = vmul.f32 %v754_v37, %v748_v25 }
 0x309   :  { %704 = vmatmul.mubr.msk.f32.vlgmr.msra.gmra.mrb[10].mxu0 %vm447_vm7, %v478_v38 }
 0x30a   :  { %v756_v39 = vpop.eup %755  ;;  %706 = vmatprep.mubr.msk.f32.mxu0 %vm760_vm0, %v761_v4 }
 0x30b   :  { %v479_v40 = vmul.f32 %v756_v39, %v750_v27 }
 0x30d   :  { %707 = vmatmul.mubr.msk.f32.gmra.mrb[12].mxu0 %vm447_vm7, %v479_v40 }
 0x30e   :  { %v758_v41 = vpop.eup %757  ;;  %709 = vmatprep.mubr.msk.f32.mxu0 %vm760_vm0, %v761_v4 }
 0x30f   :  { %v480_v42 = vmul.f32 %v758_v41, %v752_v29 }
 0x311   :  { %710 = vmatmul.mubr.msk.f32.gmra.mrb[14].mxu0 %vm447_vm7, %v480_v42 }
 0x3dc   :  { %v556_v43 = vpop.f32.mrb[10].mxu0 }
 0x3dd   :  { %570 = vst [vmem:[%s969_s8] sm:$0xff] %v556_v43  ;;  %v705_v44 = vpop.f32.mrb[11].mxu0 }
 0x3e0   :  { %v561_v45 = vpop.f32.mrb[12].mxu0 }
 0x3e1   :  { %571 = vst [vmem:[%s969_s8 + $0x8] sm:$0xff] %v561_v45  ;;  %v708_v46 = vpop.f32.mrb[13].mxu0 }
 0x3e4   :  { %v566_v47 = vpop.f32.mrb[14].mxu0 }
 0x3e5   :  { %572 = vst [vmem:[%s969_s8 + $0x10] sm:$0xff] %v566_v47  ;;  %v711_v4 = vpop.f32.mrb[15].mxu0 }

</bundles_post_ra>
